<compile_context>
chip_gen: v5e
topology: v5e:2x2
jax: 0.10.0
libtpu: 0.0.40
codegen_flags: <defaults>
</compile_context>

<pallas_src>
import jax
import jax.numpy as jnp
from jax import lax
from jax.experimental import pallas as pl
from jax.experimental.pallas import tpu as pltpu


# -----------------------------------------------------------------------------
# Pallas kernel: full grid-attention forward, whole batch in one step.
# Activations are (B*C, spatial) with the spatial axis on lanes.
# -----------------------------------------------------------------------------
def grid_attention_kernel(x_ref,      # (BC, HW)    bf16  input, batch on sublanes
                          g_ref,      # (BC, HgWg)  bf16  gating signal
                          wth_ref,    # (BC, BC)    bf16  block-diag theta 1x1 (no bias)
                          wphi_ref,   # (BC, BC)    bf16  block-diag phi 1x1
                          bphi_ref,   # (BC, 1)     f32   phi bias (applied post-upsample)
                          r2t_ref,    # (HgWg, HW)  bf16  bilinear-upsample operator^T
                          wpsi_ref,   # (BC, BC)    bf16  block-diag channel-replicating psi
                          bpsi_ref,   # (1, 1)      f32   psi bias (SMEM scalar)
                          ww_ref,     # (BC, BC)    bf16  block-diag W 1x1, BN folded
                          bw_ref,     # (BC, 1)     f32   W bias + BN shift folded
                          o_ref):     # (BC, HW)    f32
    x = x_ref[...]
    g = g_ref[...]

    # Hoisted: W(sig*x) == sig * (W@x) since the gate is constant over channels.
    # Independent of the theta/phi/psi chain -> overlaps on the MXU.
    wx = jnp.dot(ww_ref[...], x, preferred_element_type=jnp.float32)

    # theta(x): block-diag 1x1 conv, lane-dense N = HW.
    theta_x = jnp.dot(wth_ref[...], x, preferred_element_type=jnp.float32)

    # phi(g) on the coarse grid (bias deferred), then bilinear upsample
    # (HgWg -> HW) as one lane-dense matmul against the precomputed operator.
    phi_g = jnp.dot(wphi_ref[...], g, preferred_element_type=jnp.float32)
    phi_up = jnp.dot(phi_g.astype(jnp.bfloat16), r2t_ref[...],
                     preferred_element_type=jnp.float32)

    # f = relu(theta_x + upsample(phi_g) + b_phi); b_phi commutes through the
    # upsample because the interpolation weights for each output pixel sum to 1.
    f = jnp.maximum(theta_x + phi_up + bphi_ref[...], 0.0)

    # psi(f): (inter -> 1) reduction with the (1 -> C) replication folded into
    # the weight, so the result is already the gate broadcast to every channel
    # row of its batch element.
    psi = jnp.dot(wpsi_ref[...], f.astype(jnp.bfloat16),
                  preferred_element_type=jnp.float32) + bpsi_ref[0, 0]

    # sigmoid: exp -> EUP slot, approximate reciprocal -> EUP slot.
    sig = pl.reciprocal(1.0 + jnp.exp(-psi), approx=True)

    # Second F.interpolate is the identity (stride-1 theta) -> omitted.
    # y = sig * x ; W(y) == sig * wx (hoisted above).
    o_ref[...] = wx * sig + bw_ref[...]


# -----------------------------------------------------------------------------
# Wrapper
# -----------------------------------------------------------------------------
def grid_attention_forward(x_pack, g_pack, w_theta, w_phi, b_phi, r2t,
                           w_psi, b_psi, w_w, b_w):
    BC, HW = x_pack.shape
    _, HgWg = g_pack.shape

    def full2d(shape):
        return pl.BlockSpec(shape, lambda i: (0, 0))

    return pl.pallas_call(
        grid_attention_kernel,
        out_shape=jax.ShapeDtypeStruct((BC, HW), jnp.float32),
        grid_spec=pltpu.PrefetchScalarGridSpec(
            num_scalar_prefetch=0,
            grid=(1,),                               # whole batch in one step
            in_specs=[
                full2d((BC, HW)),                    # x
                full2d((BC, HgWg)),                  # g
                full2d((BC, BC)),                    # theta weight
                full2d((BC, BC)),                    # phi weight
                full2d((BC, 1)),                     # phi bias
                full2d((HgWg, HW)),                  # upsample operator^T
                full2d((BC, BC)),                    # psi weight (replicating)
                pl.BlockSpec(memory_space=pltpu.MemorySpace.SMEM),  # psi bias
                full2d((BC, BC)),                    # W weight (BN folded)
                full2d((BC, 1)),                     # W bias (BN folded)
            ],
            out_specs=full2d((BC, HW)),
        ),
        compiler_params=pltpu.CompilerParams(
            dimension_semantics=("arbitrary",)),
    )(x_pack, g_pack, w_theta, w_phi, b_phi, r2t, w_psi, b_psi, w_w, b_w)


# -----------------------------------------------------------------------------
# Bilinear interpolation helpers (PyTorch align_corners=False convention).
# Host-side / plain JAX, outside the kernel.
# -----------------------------------------------------------------------------
def _src_index(out_size, in_size):
    scale = in_size / out_size
    c = (jnp.arange(out_size, dtype=jnp.float32) + 0.5) * scale - 0.5
    c = jnp.maximum(c, 0.0)
    i0 = jnp.floor(c).astype(jnp.int32)
    i0 = jnp.minimum(i0, in_size - 1)
    lam = c - i0.astype(jnp.float32)
    i1 = jnp.minimum(i0 + 1, in_size - 1)
    return i0, i1, lam


def interp_matrix(out_size, in_size):
    """Dense (out_size, in_size) 1-D bilinear interpolation operator."""
    i0, i1, lam = _src_index(out_size, in_size)
    m0 = jax.nn.one_hot(i0, in_size, dtype=jnp.float32) * (1.0 - lam)[:, None]
    m1 = jax.nn.one_hot(i1, in_size, dtype=jnp.float32) * lam[:, None]
    return m0 + m1


def bilinear_resize_nchw(x, out_hw):
    """Gather-based bilinear resize (independent path for the reference)."""
    H, W = out_hw
    _, _, Hi, Wi = x.shape
    h0, h1, lh = _src_index(H, Hi)
    w0, w1, lw = _src_index(W, Wi)
    xh = (x[:, :, h0, :] * (1.0 - lh)[None, None, :, None]
          + x[:, :, h1, :] * lh[None, None, :, None])
    out = (xh[:, :, :, w0] * (1.0 - lw)[None, None, None, :]
           + xh[:, :, :, w1] * lw[None, None, None, :])
    return out


# -----------------------------------------------------------------------------
# Pure-JAX NCHW reference (mirrors the PyTorch forward) for validation.
# -----------------------------------------------------------------------------
def grid_attention_reference_nchw(x, g, p, eps=1e-5):
    dn = ('NCHW', 'OIHW', 'NCHW')

    def conv(z, w):
        return lax.conv_general_dilated(z, w, (1, 1), 'VALID',
                                        dimension_numbers=dn,
                                        precision=lax.Precision.HIGHEST)

    theta_x = conv(x, p['w_theta'])
    phi_g = conv(g, p['w_phi']) + p['b_phi'].reshape(1, -1, 1, 1)
    phi_up = bilinear_resize_nchw(phi_g, theta_x.shape[2:])
    f = jnp.maximum(theta_x + phi_up, 0.0)
    psi_f = conv(f, p['w_psi']) + p['b_psi'].reshape(1, -1, 1, 1)
    sig = jax.nn.sigmoid(psi_f)
    sig = bilinear_resize_nchw(sig, x.shape[2:])     # identity (same size)
    y = sig * x
    wy = conv(y, p['w_w']) + p['b_w'].reshape(1, -1, 1, 1)
    s = p['gamma'] / jnp.sqrt(p['var'] + eps)
    t = p['beta'] - p['mean'] * s
    return wy * s.reshape(1, -1, 1, 1) + t.reshape(1, -1, 1, 1)


# -----------------------------------------------------------------------------
if __name__ == "__main__":
    B, C, H, W = 2, 4, 16, 16        # in_channels = gating = inter = 4
    Hg, Wg = 8, 8                    # coarse gating-signal resolution
    eps = 1e-5

    key = jax.random.PRNGKey(0)
    keys = jax.random.split(key, 16)

    # NOTE: the PyTorch docstring says g is (b, g_d), but phi is a Conv2d, so g
    # must be a 4-D (B, C, Hg, Wg) gating feature map.
    x_nchw = jax.random.normal(keys[0], (B, C, H, W), jnp.float32)
    g_nchw = jax.random.normal(keys[1], (B, C, Hg, Wg), jnp.float32)

    # PyTorch-layout parameters (deterministic, synthetic).
    w_theta = 0.3 * jax.random.normal(keys[2], (C, C, 1, 1), jnp.float32)
    w_phi = 0.3 * jax.random.normal(keys[3], (C, C, 1, 1), jnp.float32)
    b_phi = 0.1 * jax.random.normal(keys[4], (C,), jnp.float32)
    w_psi = 0.3 * jax.random.normal(keys[5], (1, C, 1, 1), jnp.float32)
    b_psi = 0.1 * jax.random.normal(keys[6], (1,), jnp.float32)
    w_w = 0.3 * jax.random.normal(keys[7], (C, C, 1, 1), jnp.float32)
    b_w = 0.1 * jax.random.normal(keys[8], (C,), jnp.float32)
    bn_gamma = 1.0 + 0.1 * jax.random.normal(keys[9], (C,), jnp.float32)
    bn_beta = 0.1 * jax.random.normal(keys[10], (C,), jnp.float32)
    bn_mean = 0.1 * jax.random.normal(keys[11], (C,), jnp.float32)
    bn_var = 1.0 + 0.5 * jax.random.uniform(keys[12], (C,), jnp.float32)

    # ---- repack for the kernel: batch stacked on the sublane axis -----------
    eye_b = jnp.eye(B, dtype=jnp.float32)

    w_theta_k = jnp.kron(eye_b, w_theta[:, :, 0, 0])              # (BC, BC)
    w_phi_k = jnp.kron(eye_b, w_phi[:, :, 0, 0])                  # (BC, BC)
    b_phi_k = jnp.tile(b_phi, B).reshape(B * C, 1)                # (BC, 1)

    # psi with the (1 -> C) channel replication folded in: every channel row of
    # a batch element gets that element's per-pixel gate logit.
    w_psi_rep = jnp.ones((C, 1), jnp.float32) @ w_psi[:, :, 0, 0]  # (C, C)
    w_psi_k = jnp.kron(eye_b, w_psi_rep)                           # (BC, BC)
    b_psi_k = b_psi.reshape(1, 1)                                  # SMEM scalar

    # Fold conv bias + inference BatchNorm into the W projection.
    bn_s = bn_gamma / jnp.sqrt(bn_var + eps)
    w_w_fold = w_w[:, :, 0, 0] * bn_s[:, None]
    b_w_fold = b_w * bn_s + bn_beta - bn_mean * bn_s
    w_w_k = jnp.kron(eye_b, w_w_fold)                              # (BC, BC)
    b_w_k = jnp.tile(b_w_fold, B).reshape(B * C, 1)                # (BC, 1)

    # Bilinear upsample (Hg,Wg)->(H,W) as a dense operator, transposed so the
    # kernel matmul is (BC, HgWg) @ (HgWg, HW) with lane-dense N = HW.
    ry = interp_matrix(H, Hg)                                      # (H, Hg)
    rx = interp_matrix(W, Wg)                                      # (W, Wg)
    r2t = jnp.kron(ry, rx).T                                       # (HgWg, HW)

    x_pack = x_nchw.reshape(B * C, H * W)
    g_pack = g_nchw.reshape(B * C, Hg * Wg)

    bf16 = jnp.bfloat16
    out_pack = grid_attention_forward(
        x_pack.astype(bf16), g_pack.astype(bf16),
        w_theta_k.astype(bf16), w_phi_k.astype(bf16), b_phi_k,
        r2t.astype(bf16), w_psi_k.astype(bf16), b_psi_k,
        w_w_k.astype(bf16), b_w_k)
    out_pack = jax.block_until_ready(out_pack)
    out_nchw = out_pack.reshape(B, C, H, W)

    # ---- validate against a pure-JAX f32 NCHW reference ---------------------
    ref = grid_attention_reference_nchw(
        x_nchw, g_nchw,
        dict(w_theta=w_theta, w_phi=w_phi, b_phi=b_phi, w_psi=w_psi,
             b_psi=b_psi, w_w=w_w, b_w=b_w, gamma=bn_gamma, beta=bn_beta,
             mean=bn_mean, var=bn_var),
        eps=eps)
    ref = jax.block_until_ready(ref)

    assert out_nchw.shape == (B, C, H, W)
    # Tolerance sized for bf16 MXU operands with f32 accumulation + approx
    # reciprocal in the sigmoid (reference is f32 HIGHEST precision).
    max_err = float(jnp.max(jnp.abs(out_nchw - ref)))
    assert max_err < 3e-2, f"mismatch vs reference, max abs err = {max_err}"

    print("KERNEL_OK")
</pallas_src>

<mosaic_0001>
module attributes {stable_mosaic.version = 11 : i64} {
  func.func @grid_attention_kernel(%arg0: i32, %arg1: memref<8x256xbf16, #tpu.memory_space<vmem>>, %arg2: memref<8x64xbf16, #tpu.memory_space<vmem>>, %arg3: memref<8x8xbf16, #tpu.memory_space<vmem>>, %arg4: memref<8x8xbf16, #tpu.memory_space<vmem>>, %arg5: memref<8x1xf32, #tpu.memory_space<vmem>>, %arg6: memref<64x256xbf16, #tpu.memory_space<vmem>>, %arg7: memref<8x8xbf16, #tpu.memory_space<vmem>>, %arg8: memref<1x1xf32, #tpu.memory_space<smem>>, %arg9: memref<8x8xbf16, #tpu.memory_space<vmem>>, %arg10: memref<8x1xf32, #tpu.memory_space<vmem>>, %arg11: memref<8x256xf32, #tpu.memory_space<vmem>>) attributes {dimension_semantics = [#tpu.dimension_semantics<arbitrary>], iteration_bounds = array<i64: 1>, scalar_prefetch = 0 : i64, scratch_operands = 0 : i64, tpu.core_type = #tpu.core_type<tc>, window_params = [{pipeline_mode = #tpu.pipeline_mode<synchronous>, transform_indices = @transform_0, window_bounds = array<i64: 8, 256>}, {pipeline_mode = #tpu.pipeline_mode<synchronous>, transform_indices = @transform_1, window_bounds = array<i64: 8, 64>}, {pipeline_mode = #tpu.pipeline_mode<synchronous>, transform_indices = @transform_2, window_bounds = array<i64: 8, 8>}, {pipeline_mode = #tpu.pipeline_mode<synchronous>, transform_indices = @transform_3, window_bounds = array<i64: 8, 8>}, {pipeline_mode = #tpu.pipeline_mode<synchronous>, transform_indices = @transform_4, window_bounds = array<i64: 8, 1>}, {pipeline_mode = #tpu.pipeline_mode<synchronous>, transform_indices = @transform_5, window_bounds = array<i64: 64, 256>}, {pipeline_mode = #tpu.pipeline_mode<synchronous>, transform_indices = @transform_6, window_bounds = array<i64: 8, 8>}, {transform_indices = @transform_7, window_bounds = array<i64: 1, 1>}, {pipeline_mode = #tpu.pipeline_mode<synchronous>, transform_indices = @transform_8, window_bounds = array<i64: 8, 8>}, {pipeline_mode = #tpu.pipeline_mode<synchronous>, transform_indices = @transform_9, window_bounds = array<i64: 8, 1>}, {pipeline_mode = #tpu.pipeline_mode<synchronous>, transform_indices = @transform_10, window_bounds = array<i64: 8, 256>}]} {
    %c0 = arith.constant 0 : index
    %c0_0 = arith.constant 0 : index
    %0 = vector.load %arg1[%c0, %c0_0] : memref<8x256xbf16, #tpu.memory_space<vmem>>, vector<8x256xbf16>
    %c0_1 = arith.constant 0 : index
    %c0_2 = arith.constant 0 : index
    %1 = vector.load %arg2[%c0_1, %c0_2] : memref<8x64xbf16, #tpu.memory_space<vmem>>, vector<8x64xbf16>
    %c0_3 = arith.constant 0 : index
    %c0_4 = arith.constant 0 : index
    %2 = vector.load %arg9[%c0_3, %c0_4] : memref<8x8xbf16, #tpu.memory_space<vmem>>, vector<8x8xbf16>
    %cst = arith.constant dense<0.000000e+00> : vector<8x256xf32>
    %3 = tpu.matmul %2, %0, %cst {dimension_numbers = #tpu.dot_dimension_numbers<[1], [0], [0], [1], [0, 0, 1, 1], [], []>} : vector<8x8xbf16>, vector<8x256xbf16>, vector<8x256xf32> -> vector<8x256xf32>
    %c0_5 = arith.constant 0 : index
    %c0_6 = arith.constant 0 : index
    %4 = vector.load %arg3[%c0_5, %c0_6] : memref<8x8xbf16, #tpu.memory_space<vmem>>, vector<8x8xbf16>
    %cst_7 = arith.constant dense<0.000000e+00> : vector<8x256xf32>
    %5 = tpu.matmul %4, %0, %cst_7 {dimension_numbers = #tpu.dot_dimension_numbers<[1], [0], [0], [1], [0, 0, 1, 1], [], []>} : vector<8x8xbf16>, vector<8x256xbf16>, vector<8x256xf32> -> vector<8x256xf32>
    %c0_8 = arith.constant 0 : index
    %c0_9 = arith.constant 0 : index
    %6 = vector.load %arg4[%c0_8, %c0_9] : memref<8x8xbf16, #tpu.memory_space<vmem>>, vector<8x8xbf16>
    %cst_10 = arith.constant dense<0.000000e+00> : vector<8x64xf32>
    %7 = tpu.matmul %6, %1, %cst_10 {dimension_numbers = #tpu.dot_dimension_numbers<[1], [0], [0], [1], [0, 0, 1, 1], [], []>} : vector<8x8xbf16>, vector<8x64xbf16>, vector<8x64xf32> -> vector<8x64xf32>
    %8 = arith.truncf %7 : vector<8x64xf32> to vector<8x64xbf16>
    %c0_11 = arith.constant 0 : index
    %c0_12 = arith.constant 0 : index
    %9 = vector.load %arg6[%c0_11, %c0_12] : memref<64x256xbf16, #tpu.memory_space<vmem>>, vector<64x256xbf16>
    %cst_13 = arith.constant dense<0.000000e+00> : vector<8x256xf32>
    %10 = tpu.matmul %8, %9, %cst_13 {dimension_numbers = #tpu.dot_dimension_numbers<[1], [0], [0], [1], [0, 0, 1, 1], [], []>} : vector<8x64xbf16>, vector<64x256xbf16>, vector<8x256xf32> -> vector<8x256xf32>
    %11 = arith.addf %5, %10 : vector<8x256xf32>
    %c0_14 = arith.constant 0 : index
    %c0_15 = arith.constant 0 : index
    %12 = vector.load %arg5[%c0_14, %c0_15] : memref<8x1xf32, #tpu.memory_space<vmem>>, vector<8x1xf32>
    %13 = vector.broadcast %12 : vector<8x1xf32> to vector<8x256xf32>
    %14 = arith.addf %11, %13 : vector<8x256xf32>
    %cst_16 = arith.constant 0.000000e+00 : f32
    %15 = vector.broadcast %cst_16 : f32 to vector<8x256xf32>
    %16 = arith.maximumf %14, %15 : vector<8x256xf32>
    %c0_17 = arith.constant 0 : index
    %c0_18 = arith.constant 0 : index
    %17 = vector.load %arg7[%c0_17, %c0_18] : memref<8x8xbf16, #tpu.memory_space<vmem>>, vector<8x8xbf16>
    %18 = arith.truncf %16 : vector<8x256xf32> to vector<8x256xbf16>
    %cst_19 = arith.constant dense<0.000000e+00> : vector<8x256xf32>
    %19 = tpu.matmul %17, %18, %cst_19 {dimension_numbers = #tpu.dot_dimension_numbers<[1], [0], [0], [1], [0, 0, 1, 1], [], []>} : vector<8x8xbf16>, vector<8x256xbf16>, vector<8x256xf32> -> vector<8x256xf32>
    %c0_20 = arith.constant 0 : index
    %c0_21 = arith.constant 0 : index
    %20 = memref.load %arg8[%c0_20, %c0_21] : memref<1x1xf32, #tpu.memory_space<smem>>
    %21 = vector.broadcast %20 : f32 to vector<8x256xf32>
    %22 = arith.addf %19, %21 : vector<8x256xf32>
    %cst_22 = arith.constant 0.000000e+00 : f32
    %23 = vector.broadcast %cst_22 : f32 to vector<8x256xf32>
    %24 = arith.subf %23, %22 : vector<8x256xf32>
    %25 = math.exp %24 : vector<8x256xf32>
    %cst_23 = arith.constant 1.000000e+00 : f32
    %26 = vector.broadcast %cst_23 : f32 to vector<8x256xf32>
    %27 = arith.addf %26, %25 : vector<8x256xf32>
    %28 = tpu.reciprocal %27 {approx = true} : vector<8x256xf32> -> vector<8x256xf32>
    %29 = arith.mulf %3, %28 : vector<8x256xf32>
    %c0_24 = arith.constant 0 : index
    %c0_25 = arith.constant 0 : index
    %30 = vector.load %arg10[%c0_24, %c0_25] : memref<8x1xf32, #tpu.memory_space<vmem>>, vector<8x1xf32>
    %31 = vector.broadcast %30 : vector<8x1xf32> to vector<8x256xf32>
    %32 = arith.addf %29, %31 : vector<8x256xf32>
    %c0_26 = arith.constant 0 : index
    %c0_27 = arith.constant 0 : index
    %33 = vector.load %arg11[%c0_26, %c0_27] : memref<8x256xf32, #tpu.memory_space<vmem>>, vector<8x256xf32>
    tpu.vector_store %arg11[%c0_26, %c0_27], %32 {strides = array<i32>} : memref<8x256xf32, #tpu.memory_space<vmem>>, vector<8x256xf32>,
    return
  }
  func.func @transform_0(%arg0: i32) -> (i32, i32) {
    %c0_i32 = arith.constant 0 : i32
    %c0_i32_0 = arith.constant 0 : i32
    %c0_i32_1 = arith.constant 0 : i32
    return %c0_i32, %c0_i32_0 : i32, i32
  }
  func.func @transform_1(%arg0: i32) -> (i32, i32) {
    %c0_i32 = arith.constant 0 : i32
    %c0_i32_0 = arith.constant 0 : i32
    %c0_i32_1 = arith.constant 0 : i32
    return %c0_i32, %c0_i32_0 : i32, i32
  }
  func.func @transform_2(%arg0: i32) -> (i32, i32) {
    %c0_i32 = arith.constant 0 : i32
    %c0_i32_0 = arith.constant 0 : i32
    %c0_i32_1 = arith.constant 0 : i32
    return %c0_i32, %c0_i32_0 : i32, i32
  }
  func.func @transform_3(%arg0: i32) -> (i32, i32) {
    %c0_i32 = arith.constant 0 : i32
    %c0_i32_0 = arith.constant 0 : i32
    %c0_i32_1 = arith.constant 0 : i32
    return %c0_i32, %c0_i32_0 : i32, i32
  }
  func.func @transform_4(%arg0: i32) -> (i32, i32) {
    %c0_i32 = arith.constant 0 : i32
    %c0_i32_0 = arith.constant 0 : i32
    %c0_i32_1 = arith.constant 0 : i32
    return %c0_i32, %c0_i32_0 : i32, i32
  }
  func.func @transform_5(%arg0: i32) -> (i32, i32) {
    %c0_i32 = arith.constant 0 : i32
    %c0_i32_0 = arith.constant 0 : i32
    %c0_i32_1 = arith.constant 0 : i32
    return %c0_i32, %c0_i32_0 : i32, i32
  }
  func.func @transform_6(%arg0: i32) -> (i32, i32) {
    %c0_i32 = arith.constant 0 : i32
    %c0_i32_0 = arith.constant 0 : i32
    %c0_i32_1 = arith.constant 0 : i32
    return %c0_i32, %c0_i32_0 : i32, i32
  }
  func.func @transform_7(%arg0: i32) -> (i32, i32) {
    %c0_i32 = arith.constant 0 : i32
    %c0_i32_0 = arith.constant 0 : i32
    %c0_i32_1 = arith.constant 0 : i32
    return %c0_i32, %c0_i32_0 : i32, i32
  }
  func.func @transform_8(%arg0: i32) -> (i32, i32) {
    %c0_i32 = arith.constant 0 : i32
    %c0_i32_0 = arith.constant 0 : i32
    %c0_i32_1 = arith.constant 0 : i32
    return %c0_i32, %c0_i32_0 : i32, i32
  }
  func.func @transform_9(%arg0: i32) -> (i32, i32) {
    %c0_i32 = arith.constant 0 : i32
    %c0_i32_0 = arith.constant 0 : i32
    %c0_i32_1 = arith.constant 0 : i32
    return %c0_i32, %c0_i32_0 : i32, i32
  }
  func.func @transform_10(%arg0: i32) -> (i32, i32) {
    %c0_i32 = arith.constant 0 : i32
    %c0_i32_0 = arith.constant 0 : i32
    %c0_i32_1 = arith.constant 0 : i32
    return %c0_i32, %c0_i32_0 : i32, i32
  }
}

</mosaic_0001>

<bundles_post_ra>
// kernel: tpu_custom_call.1
= control target key start
LH: loop header
LB: loop body
LE: loop exit
PB: predicated region body
PF: predicated region fallthrough
CT: control target
= control target key end

     0   :  { %16 = vsyncpa [#allocation4], 0  ;;  %s619_s0 = inlined_call_operand.vmem [shape: bf16[8,256], index: 0, kind: input, shape index: {}]   ;;  %s620_s1 = inlined_call_operand.vmem [shape: bf16[8,64], index: 1, kind: input, shape index: {}]   ;;  %s621_s2 = inlined_call_operand.vmem [shape: bf16[8,8], index: 2, kind: input, shape index: {}]   ;;  %s622_s3 = inlined_call_operand.hbm [shape: bf16[8,8], index: 3, kind: input, shape index: {}]   ;;  %s623_s4 = inlined_call_operand.vmem [shape: f32[8,1], index: 4, kind: input, shape index: {}]   ;;  %s624_s5 = inlined_call_operand.hbm [shape: bf16[64,256], index: 5, kind: input, shape index: {}]   ;;  %s625_s6 = inlined_call_operand.vmem [shape: bf16[8,8], index: 6, kind: input, shape index: {}]   ;;  %s626_s7 = inlined_call_operand.<no memory space> [shape: f32[1,1], index: 7, kind: input, shape index: {}]   ;;  %s627_s8 = inlined_call_operand.hbm [shape: bf16[8,8], index: 8, kind: input, shape index: {}]   ;;  %s628_s9 = inlined_call_operand.vmem [shape: f32[8,1], index: 9, kind: input, shape index: {}]   ;;  %s629_s10 = inlined_call_operand.hbm [shape: f32[8,256], index: 10, kind: output, shape index: {}]  }
   0x1   :  { %17 = vsyncpa [#allocation7], 0  ;;  %s42_s15 = sshll.u32 %s624_s5, 4  ;;  %s43_s15 = int_to_ptr.hbm [resolvable:$true] %s42_s15 }
   0x2   :  { %18 = vsyncpa [#allocation5], 0  ;;  %s512_s16 = smov [#allocation6]   ;;  %s30_s20 = sshll.u32 %s622_s3, 4  ;;  %s31_s20 = int_to_ptr.hbm [resolvable:$true] %s30_s20 }
   0x3   :  { %s44_s17 = sshll.u32 %s512_s16, 4  ;;  %s513_s21 = smov 128   ;;  %s45_s17 = int_to_ptr.vmem [resolvable:$true] %s44_s17 }
   0x4   :  { %s514_s22 = smov 8   ;;  %s515_s23 = smov [#allocation3]  }
   0x5   :  { %50 = dma.hbm_to_vmem [thread:$0]  %s43_s15, 1024, %s45_s17, [#allocation7], %s513_s21, %s513_s21, %s514_s22  }
   0x6   :  { %s32_s24 = sshll.u32 %s515_s23, 4  ;;  %s60_s27 = sshll.u32 %s627_s8, 4  ;;  %s33_s24 = int_to_ptr.vmem [resolvable:$true] %s32_s24  ;;  %s61_s27 = int_to_ptr.hbm [resolvable:$true] %s60_s27 }
   0x7   :  { %35 = dma.hbm_to_vmem [thread:$0]  %s31_s20, 64, %s33_s24, [#allocation4]  }
   0x8   :  { %s516_s5 = smov [#allocation8]  }
   0x9   :  { %s62_s28 = sshll.u32 %s516_s5, 4  ;;  %s63_s28 = int_to_ptr.vmem [resolvable:$true] %s62_s28 }
   0xa   :  { %65 = dma.hbm_to_vmem [thread:$0]  %s61_s27, 64, %s63_s28, [#allocation7]  }
   0xb   :  { %506 = dma.done.wait [#allocation4], 64  }
   0xc   :  { %507 = vsyncadd [#allocation4], 4294967232 }
   0xd   :  { %508 = dma.done.wait [#allocation7], 1088  }
   0xe   :  { %509 = vsyncadd [#allocation7], 4294966208  ;;  %vm93_vm0 = vcmask 1043456   ;;  %v82_v0 = vld [vmem:[%s620_s1] sm:$0xf]  ;;  %vm89_vm1 = vcmask 64512  }
   0xf   :  { %v81_v1 = vld [vmem:[%s619_s0] sm:$0xff]  ;;  %v132_v2 = vsel %vm93_vm0, %v82_v0, 0  ;;  %v374_v6 = vld [vmem:[#allocation6 + $0x30] sm:$0xf]  ;;  %v393_v7 = vld [vmem:[#allocation6 + $0x34] sm:$0xf0] }
  0x10   :  { %v127_v3 = vld [vmem:[#allocation3] sm:$0xf]  ;;  %v86_v4 = vunpack.c.h.b16 %v81_v1  ;;  %v85_v5 = vunpack.c.l.b16 %v81_v1  ;;  %141 = vmatpush.bf16.msra.mxu2 %v132_v2  ;;  %v392_v8 = vld [vmem:[#allocation6 + $0x34] sm:$0xf]  ;;  %v375_v12 = vor.u32 %v393_v7, %v374_v6  ;;  %v366_v14 = vld [vmem:[#allocation6 + $0x20] sm:$0xf]  ;;  %v269_v2 = vstv %s626_s7 }
  0x11   :  { %v376_v9 = vld [vmem:[#allocation6 + $0x38] sm:$0xf0]  ;;  %v391_v15 = vld [vmem:[#allocation6 + $0x24] sm:$0xf0]  ;;  %v390_v16 = vld [vmem:[#allocation6 + $0x24] sm:$0xf] }
  0x12   :  { %v88_v10 = vpack.c.b16 %v86_v4, %v86_v4  ;;  %v87_v11 = vpack.c.b16 %v85_v5, %v85_v5  ;;  %v379_v13 = vor.u32 %v392_v8, %v376_v9  ;;  %v368_v17 = vld [vmem:[#allocation6 + $0x28] sm:$0xf0]  ;;  %204 = vmatpush.bf16.msra.mxu3 %v375_v12  ;;  %v83_v20 = vld [vmem:[#allocation8] sm:$0xf]  ;;  %v367_v21 = vor.u32 %v391_v15, %v366_v14  ;;  %v358_v23 = vld [vmem:[#allocation6 + $0x10] sm:$0xf] }
  0x13   :  { %347 = vmatmul.msk.bf16.vlgmr.msra.gmra.mxu2 %vm89_vm1, %v127_v3  ;;  %v371_v22 = vor.u32 %v390_v16, %v368_v17  ;;  %v389_v24 = vld [vmem:[#allocation6 + $0x14] sm:$0xf0]  ;;  %v388_v25 = vld [vmem:[#allocation6 + $0x14] sm:$0xf]  ;;  %v360_v26 = vld [vmem:[#allocation6 + $0x18] sm:$0xf0] }
  0x14   :  { %v98_v18 = vsel %vm93_vm0, %v88_v10, 0  ;;  %v95_v19 = vsel %vm93_vm0, %v87_v11, 0  ;;  %v359_v27 = vor.u32 %v389_v24, %v358_v23  ;;  %v363_v28 = vor.u32 %v388_v25, %v360_v26  ;;  %v126_v29 = vld [vmem:[%s621_s2] sm:$0xf]  ;;  %v350_v30 = vld [vmem:[#allocation6] sm:$0xf] }
  0x15   :  { %120 = vmatpush.bf16.msra.mxu1 %v98_v18  ;;  %107 = vmatpush.bf16.msra.mxu0 %v95_v19  ;;  %v387_v31 = vld [vmem:[#allocation6 + $0x4] sm:$0xf0]  ;;  %v386_v32 = vld [vmem:[#allocation6 + $0x4] sm:$0xf]  ;;  %v352_v34 = vld [vmem:[#allocation6 + $0x8] sm:$0xf0] }
  0x16   :  { %249 = vmatpush.bf16.msrb.mxu2 %v98_v18  ;;  %205 = vmatpush.bf16.msra.mxu3 %v367_v21  ;;  %v351_v33 = vor.u32 %v387_v31, %v350_v30  ;;  %v355_v35 = vor.u32 %v386_v32, %v352_v34  ;;  %v255_v36 = vld [vmem:[%s623_s4] sm:$0xff]  ;;  %v517_v37 = vmov 0   ;;  %vm196_vm2 = vcmask 523264   ;;  %s334_s18 = sshll.u32 %s629_s10, 4  ;;  %s335_s18 = int_to_ptr.hbm [resolvable:$true] %s334_s18 }
  0x17   :  { %401 = vset.pattern.permute.xlu0 %v517_v37  ;;  %v317_v38 = vld [vmem:[%s628_s9] sm:$0xff] }
  0x18   :  { %346 = vmatmul.msk.bf16.vlgmr.msra.gmra.mxu1 %vm89_vm1, %v83_v20  ;;  %345 = vmatmul.msk.bf16.vlgmr.msra.gmra.mxu0 %vm89_vm1, %v83_v20  ;;  %v265_v61 = vld [vmem:[%s625_s6] sm:$0xf]  ;;  %s518_s6 = smov [#allocation9]  }
  0x19   :  { %217 = vmatpush.bf16.msrb.mxu0 %v379_v13  ;;  %236 = vmatpush.bf16.msrb.mxu1 %v95_v19  ;;  %s332_s7 = sshll.u32 %s518_s6, 4  ;;  %s333_s7 = int_to_ptr.vmem [resolvable:$true] %s332_s7 }
  0x1a   :  { %206 = vmatpush.bf16.msra.mxu3 %v359_v27  ;;  %258 = vperm.xlu0 %401, %v255_v36  }
  0x1d   :  { %218 = vmatpush.bf16.msrb.mxu0 %v371_v22 }
  0x1e   :  { %207 = vmatpush.bf16.msra.mxu3 %v351_v33 }
  0x21   :  { %219 = vmatpush.bf16.msrb.mxu0 %v363_v28 }
  0x22   :  { %320 = vperm.xlu0 %401, %v317_v38  }
  0x23   :  { %383 = vmatmul.msk.bf16.vlgmr.msrb.gmra.mxu2 %vm89_vm1, %v126_v29 }
  0x25   :  { %220 = vmatpush.bf16.msrb.mxu0 %v355_v35 }
  0x28   :  { %382 = vmatmul.msk.bf16.vlgmr.msrb.gmra.mxu1 %vm89_vm1, %v126_v29 }
  0x8c   :  { %v259_v52 = vpop.permute.xlu0 %258 }
  0x94   :  { %v321_v17 = vpop.permute.xlu0 %320 }
  0x95   :  { %v122_v39 = vpop.f32.mrf.mxu1  ;;  %v109_v40 = vpop.f32.mrf.mxu0 }
  0x96   :  { %v143_v41 = vpop.f32.mrf.mxu2 }
  0x97   :  { %v147_v42 = vpack.c.bf16 %v143_v41, %v143_v41 }
  0x99   :  { %380 = vmatmul.msk.bf16.vlgmr.msra.gmra.mxu3 %vm196_vm2, %v147_v42  ;;  %381 = vmatmul.msk.bf16.vlgmr.msrb.gmra.mxu0 %vm196_vm2, %v147_v42 }
  0x9d   :  { %v124_v43 = vpop.f32.mrf.mxu1  ;;  %v111_v44 = vpop.f32.mrf.mxu0 }
  0x9e   :  { %v145_v45 = vpop.f32.mrf.mxu2 }
  0xa5   :  { %v238_v46 = vpop.f32.mrf.mxu1 }
  0xa6   :  { %v251_v48 = vpop.f32.mrf.mxu2 }
  0xad   :  { %v240_v47 = vpop.f32.mrf.mxu1 }
  0xae   :  { %v253_v49 = vpop.f32.mrf.mxu2 }
 0x116   :  { %v222_v50 = vpop.f32.mrf.mxu0 }
 0x117   :  { %v252_v51 = vadd.f32 %v251_v48, %v222_v50 }
 0x119   :  { %v262_v53 = vadd.f32 %v259_v52, %v252_v51 }
 0x11b   :  { %v264_v54 = vmax.f32 %v262_v53, 0.0 }
 0x11c   :  { %v209_v55 = vpop.f32.mrf.mxu3 }
 0x11d   :  { %v267_v56 = vpack.c.bf16 %v264_v54, %v264_v54  ;;  %v239_v57 = vadd.f32 %v238_v46, %v209_v55 }
 0x11e   :  { %v224_v58 = vpop.f32.mrf.mxu0 }
 0x11f   :  { %v261_v59 = vadd.f32 %v259_v52, %v239_v57  ;;  %v277_v60 = vsel %vm93_vm0, %v267_v56, 0 }
 0x120   :  { %299 = vmatpush.bf16.msra.mxu0 %v277_v60 }
 0x121   :  { %v263_v62 = vmax.f32 %v261_v59, 0.0 }
 0x123   :  { %385 = vmatmul.msk.bf16.vlgmr.msra.gmra.mxu0 %vm89_vm1, %v265_v61  ;;  %v266_v63 = vpack.c.bf16 %v263_v62, %v263_v62 }
 0x124   :  { %v211_v0 = vpop.f32.mrf.mxu3 }
 0x125   :  { %v274_v1 = vsel %vm93_vm0, %v266_v63, 0 }
 0x126   :  { %286 = vmatpush.bf16.msrb.mxu3 %v274_v1 }
 0x129   :  { %384 = vmatmul.msk.bf16.vlgmr.msrb.gmra.mxu3 %vm89_vm1, %v265_v61 }
 0x1a0   :  { %v301_v3 = vpop.f32.mrf.mxu0 }
 0x1a1   :  { %v302_v4 = vadd.f32 %v301_v3, %v269_v2 }
 0x1a3   :  { %v306_v5 = vsub.f32 0.0, %v302_v4 }
 0x1a5   :  { %v309_v6 = vmul.f32 1.442695, %v306_v5 }
 0x1a7   :  { %402 = vpow2.f32 %v309_v6 }
 0x1a8   :  { %v303_v7 = vpop.f32.mrf.mxu0 }
 0x1ac   :  { %v288_v8 = vpop.f32.mrf.mxu3 }
 0x1ad   :  { %v403_v9 = vpop.eup %402  ;;  %v289_v10 = vadd.f32 %v288_v8, %v269_v2 }
 0x1ae   :  { %v312_v11 = vadd.f32 1.0, %v403_v9 }
 0x1af   :  { %v305_v12 = vsub.f32 0.0, %v289_v10 }
 0x1b0   :  { %404 = vrcp.f32 %v312_v11 }
 0x1b1   :  { %v307_v13 = vmul.f32 1.442695, %v305_v12 }
 0x1b3   :  { %406 = vpow2.f32 %v307_v13 }
 0x1b4   :  { %v290_v14 = vpop.f32.mrf.mxu3 }
 0x1b6   :  { %v405_v15 = vpop.eup %404 }
 0x1b7   :  { %v316_v16 = vmul.f32 %v405_v15, %v122_v39 }
 0x1b9   :  { %v407_v18 = vpop.eup %406  ;;  %v324_v19 = vadd.f32 %v321_v17, %v316_v16 }
 0x1ba   :  { %v311_v20 = vadd.f32 1.0, %v407_v18 }
 0x1bb   :  { %326 = vst [vmem:[#allocation9 + $0x8] sm:$0xff] %v324_v19 }
 0x1bc   :  { %408 = vrcp.f32 %v311_v20 }
 0x1c2   :  { %v409_v21 = vpop.eup %408 }
 0x1c3   :  { %v315_v22 = vmul.f32 %v409_v21, %v109_v40 }
 0x1c5   :  { %v323_v23 = vadd.f32 %v321_v17, %v315_v22 }
 0x1c7   :  { %325 = vst [vmem:[#allocation9] sm:$0xff] %v323_v23 }
 0x1c8   :  { %337 = dma.vmem_to_hbm [thread:$0]  %s333_s7, 256, %s335_s18, [#allocation5]  }
 0x1c9   :  { %510 = dma.done.wait [#allocation5], 256  }
 0x1ca   :  { %511 = vsyncadd [#allocation5], 4294967040 }
 0x1cb   :  { %342 = vsyncpa [#allocation4], 1 }
 0x1cc   :  { %343 = vsyncpa [#allocation7], 1 }
 0x1cd   :  { %344 = vsyncpa [#allocation5], 1 }

</bundles_post_ra>
